<compile_context>
chip_gen: v5e
topology: v5e:2x2
jax: 0.10.0
libtpu: 0.0.40
codegen_flags: <defaults>
</compile_context>

<pallas_src>
import jax
import jax.numpy as jnp
from jax.experimental import pallas as pl
from jax.experimental.pallas import tpu as pltpu


def _round_up(x, m):
    return ((x + m - 1) // m) * m


def lstm_seq_kernel(x_ref, h0_ref, c0_ref, wx_ref, wh_ref, bg_ref, wo_ref,
                    bo_ref, out_ref, hfin_ref, cfin_ref, h_scr, c_scr):
    """One timestep of the fused-sequence LSTM (grid axis 0 = time).

    x_ref   : (Bp, Ip)    bf16   this step's input
    h0_ref  : (Bp, Hp)    f32    initial hidden (used only at t == 0)
    c0_ref  : (Bp, Hp)    f32    initial cell memory (used only at t == 0)
    wx_ref  : (Ip, 4*Hp)  bf16   stacked gate weights (x part)  [F | I | O | M]
    wh_ref  : (Hp, 4*Hp)  bf16   stacked gate weights (h part)  [F | I | O | M]
    bg_ref  : (1, 4*Hp)   f32    stacked gate biases
    wo_ref  : (Hp, Op)    bf16   output projection weight
    bo_ref  : (1, Op)     f32    output projection bias (-1e30 on padded lanes)
    out_ref : (Bp, Op)    f32    per-step log-softmax output
    hfin_ref: (Bp, Hp)    f32    final hidden (written at last step)
    cfin_ref: (Bp, Hp)    f32    final memory (written at last step)
    h_scr, c_scr : VMEM scratch carrying the recurrent state across steps.
    """
    t = pl.program_id(0)
    Hp = h_scr.shape[1]

    @pl.when(t == 0)
    def _():
        h_scr[...] = h0_ref[...]
        c_scr[...] = c0_ref[...]

    h = h_scr[...]
    c = c_scr[...]

    # Fused gate matmuls on the MXU: bf16 inputs, f32 accumulation.
    gates = jnp.dot(x_ref[...], wx_ref[...], preferred_element_type=jnp.float32)
    gates = gates + jnp.dot(h.astype(jnp.bfloat16), wh_ref[...],
                            preferred_element_type=jnp.float32)
    gates = gates + bg_ref[...]

    # Each gate is a full lane-dense (Bp, 128k) slab -> pure VPU/EUP work.
    f = jax.nn.sigmoid(gates[:, 0 * Hp:1 * Hp])
    i = jax.nn.sigmoid(gates[:, 1 * Hp:2 * Hp])
    o = jax.nn.sigmoid(gates[:, 2 * Hp:3 * Hp])
    m = jnp.tanh(gates[:, 3 * Hp:4 * Hp])

    c_new = c * f + m * i
    h_new = o * jnp.tanh(c_new)

    h_scr[...] = h_new
    c_scr[...] = c_new

    # Output projection + numerically stable LogSoftmax over lane-dense Op.
    logits = jnp.dot(h_new.astype(jnp.bfloat16), wo_ref[...],
                     preferred_element_type=jnp.float32) + bo_ref[...]
    mx = jnp.max(logits, axis=1, keepdims=True)
    shifted = logits - mx
    lse = jnp.log(jnp.sum(jnp.exp(shifted), axis=1, keepdims=True))
    out_ref[...] = (shifted - lse).astype(out_ref.dtype)

    @pl.when(t == pl.num_programs(0) - 1)
    def _():
        hfin_ref[...] = h_new
        cfin_ref[...] = c_new


def lstm_sequence(x_seq, hidden, memory, kparams, output_size):
    """Run T LSTM-cell steps (module forward applied T times) in one kernel.

    x_seq  : (T, B, I) f32
    hidden : (B, H) f32
    memory : (B, H) f32
    kparams: packed/padded kernel params from pack_params()
    Returns (log_probs_seq (T, B, O), hidden (B, H), memory (B, H)).
    """
    T, B, I = x_seq.shape
    H = hidden.shape[1]
    Hp = kparams["wh"].shape[0]
    Op = kparams["bo"].shape[1]
    Bp = _round_up(max(B, 8), 8)

    # Pad activations to hardware granules (batch -> sublane, features -> lane).
    xp = jnp.zeros((T, Bp, I), jnp.bfloat16).at[:, :B, :].set(
        x_seq.astype(jnp.bfloat16))
    hp = jnp.zeros((Bp, Hp), jnp.float32).at[:B, :H].set(hidden)
    cp = jnp.zeros((Bp, Hp), jnp.float32).at[:B, :H].set(memory)

    out_shapes = (
        jax.ShapeDtypeStruct((T, Bp, Op), jnp.float32),  # per-step log-softmax
        jax.ShapeDtypeStruct((Bp, Hp), jnp.float32),     # final hidden
        jax.ShapeDtypeStruct((Bp, Hp), jnp.float32),     # final memory
    )

    const = lambda t: (0, 0)  # weights / state: same block every step (one DMA)

    out_seq, h_fin, c_fin = pl.pallas_call(
        lstm_seq_kernel,
        out_shape=out_shapes,
        grid=(T,),
        in_specs=[
            pl.BlockSpec((None, Bp, I), lambda t: (t, 0, 0)),   # x_t
            pl.BlockSpec((Bp, Hp), const),                      # h0
            pl.BlockSpec((Bp, Hp), const),                      # c0
            pl.BlockSpec((I, 4 * Hp), const),                   # Wx
            pl.BlockSpec((Hp, 4 * Hp), const),                  # Wh
            pl.BlockSpec((1, 4 * Hp), const),                   # gate bias
            pl.BlockSpec((Hp, Op), const),                      # Wo
            pl.BlockSpec((1, Op), const),                       # out bias
        ],
        out_specs=(
            pl.BlockSpec((None, Bp, Op), lambda t: (t, 0, 0)),  # log-probs
            pl.BlockSpec((Bp, Hp), const),                      # final hidden
            pl.BlockSpec((Bp, Hp), const),                      # final memory
        ),
        scratch_shapes=[
            pltpu.VMEM((Bp, Hp), jnp.float32),                  # hidden carry
            pltpu.VMEM((Bp, Hp), jnp.float32),                  # memory carry
        ],
        compiler_params=pltpu.CompilerParams(
            dimension_semantics=("arbitrary",)),                # recurrence
    )(xp, hp, cp, kparams["wx"], kparams["wh"], kparams["bg"],
      kparams["wo"], kparams["bo"])

    return (out_seq[:, :B, :output_size], h_fin[:B, :H], c_fin[:B, :H])


def lstm_forward(x, hidden, memory, kparams, output_size):
    """Single-step forward matching the PyTorch module's forward()."""
    out_seq, h, c = lstm_sequence(x[None], hidden, memory, kparams, output_size)
    return out_seq[0], h, c


def init_params(key, input_size, hidden_size, output_size):
    """Logical (PyTorch-equivalent) params, nn.Linear-style uniform init."""
    D = input_size + hidden_size
    ks = jax.random.split(key, 10)

    def linear(kw, kb, fan_in, fan_out):
        bound = 1.0 / jnp.sqrt(jnp.float32(fan_in))
        w = jax.random.uniform(kw, (fan_in, fan_out), jnp.float32, -bound, bound)
        b = jax.random.uniform(kb, (fan_out,), jnp.float32, -bound, bound)
        return w, b

    wf, bf = linear(ks[0], ks[1], D, hidden_size)      # forget_gate
    wi, bi = linear(ks[2], ks[3], D, hidden_size)      # input_gate
    wo_g, bo_g = linear(ks[4], ks[5], D, hidden_size)  # output_gate
    wm, bm = linear(ks[6], ks[7], D, hidden_size)      # memory_gate
    wout, bout = linear(ks[8], ks[9], hidden_size, output_size)

    wg = jnp.concatenate([wf, wi, wo_g, wm], axis=1)   # (D, 4H) order [F,I,O,M]
    bg = jnp.concatenate([bf, bi, bo_g, bm], axis=0)   # (4H,)
    return {"wg": wg, "bg": bg, "wo": wout, "bo": bout}


def pack_params(params, input_size, hidden_size, output_size):
    """Split, pad and cast logical params into the kernel layout."""
    H = hidden_size
    Hp = _round_up(H, 128)
    Op = _round_up(output_size, 128)

    wg, bg, wo, bo = params["wg"], params["bg"], params["wo"], params["bo"]
    wx = wg[:input_size]                # (I, 4H)
    wh = wg[input_size:]                # (H, 4H)

    def pad_gate_cols(w, rows_pad):
        rows = w.shape[0]
        out = jnp.zeros((rows_pad, 4 * Hp), jnp.float32)
        for g in range(4):
            out = out.at[:rows, g * Hp:g * Hp + H].set(
                w[:, g * H:(g + 1) * H])
        return out

    wx_p = pad_gate_cols(wx, input_size)
    wh_p = pad_gate_cols(wh, Hp)

    bg_p = jnp.zeros((1, 4 * Hp), jnp.float32)
    for g in range(4):
        bg_p = bg_p.at[0, g * Hp:g * Hp + H].set(bg[g * H:(g + 1) * H])

    wo_p = jnp.zeros((Hp, Op), jnp.float32).at[:H, :output_size].set(wo)
    # Padded logit lanes get a huge negative bias -> ignored by log-softmax.
    bo_p = jnp.full((1, Op), -1e30, jnp.float32).at[0, :output_size].set(bo)

    return {
        "wx": wx_p.astype(jnp.bfloat16),
        "wh": wh_p.astype(jnp.bfloat16),
        "bg": bg_p,
        "wo": wo_p.astype(jnp.bfloat16),
        "bo": bo_p,
    }


def reference_step(x, h, c, params, hidden_size):
    """Pure-JAX reference step matching the kernel's numerics (bf16 MXU inputs,
    f32 accumulation, f32 elementwise), using the logical (unpadded) params."""
    H = hidden_size
    comb = jnp.concatenate([x, h], axis=1).astype(jnp.bfloat16)
    gates = jnp.dot(comb, params["wg"].astype(jnp.bfloat16),
                    preferred_element_type=jnp.float32) + params["bg"][None, :]
    f = jax.nn.sigmoid(gates[:, 0 * H:1 * H])
    i = jax.nn.sigmoid(gates[:, 1 * H:2 * H])
    o = jax.nn.sigmoid(gates[:, 2 * H:3 * H])
    m = jnp.tanh(gates[:, 3 * H:4 * H])
    c_new = c * f + m * i
    h_new = o * jnp.tanh(c_new)
    logits = jnp.dot(h_new.astype(jnp.bfloat16),
                     params["wo"].astype(jnp.bfloat16),
                     preferred_element_type=jnp.float32) + params["bo"][None, :]
    return jax.nn.log_softmax(logits, axis=1), h_new, c_new


if __name__ == "__main__":
    input_size, hidden_size, output_size = 16, 32, 10
    batch, seq_len = 4, 8

    key = jax.random.PRNGKey(0)
    k_x, k_h, k_m, k_p = jax.random.split(key, 4)

    x_seq = jax.random.normal(k_x, (seq_len, batch, input_size), jnp.float32)
    hidden0 = jax.random.normal(k_h, (batch, hidden_size), jnp.float32)
    memory0 = jax.random.normal(k_m, (batch, hidden_size), jnp.float32)

    params = init_params(k_p, input_size, hidden_size, output_size)
    kparams = pack_params(params, input_size, hidden_size, output_size)

    # --- single-step (module forward semantics) ---
    out1, h1, c1 = jax.block_until_ready(
        lstm_forward(x_seq[0], hidden0, memory0, kparams, output_size))
    r_out1, r_h1, r_c1 = reference_step(x_seq[0], hidden0, memory0, params,
                                        hidden_size)
    assert jnp.allclose(out1, r_out1, atol=1e-2, rtol=1e-2)
    assert jnp.allclose(h1, r_h1, atol=1e-2, rtol=1e-2)
    assert jnp.allclose(c1, r_c1, atol=1e-2, rtol=1e-2)

    # --- fused multi-step sequence (one pallas_call for all timesteps) ---
    out_seq, h_fin, c_fin = jax.block_until_ready(
        lstm_sequence(x_seq, hidden0, memory0, kparams, output_size))

    r_h, r_c = hidden0, memory0
    r_outs = []
    for t in range(seq_len):
        r_o, r_h, r_c = reference_step(x_seq[t], r_h, r_c, params, hidden_size)
        r_outs.append(r_o)
    r_out_seq = jnp.stack(r_outs, axis=0)

    assert jnp.allclose(out_seq, r_out_seq, atol=1e-2, rtol=1e-2)
    assert jnp.allclose(h_fin, r_h, atol=1e-2, rtol=1e-2)
    assert jnp.allclose(c_fin, r_c, atol=1e-2, rtol=1e-2)

    print("KERNEL_OK")
</pallas_src>

<mosaic_0001>
module attributes {stable_mosaic.version = 11 : i64} {
  func.func @lstm_seq_kernel(%arg0: i32, %arg1: memref<1x8x16xbf16, #tpu.memory_space<vmem>>, %arg2: memref<8x128xf32, #tpu.memory_space<vmem>>, %arg3: memref<8x128xf32, #tpu.memory_space<vmem>>, %arg4: memref<16x512xbf16, #tpu.memory_space<vmem>>, %arg5: memref<128x512xbf16, #tpu.memory_space<vmem>>, %arg6: memref<1x512xf32, #tpu.memory_space<vmem>>, %arg7: memref<128x128xbf16, #tpu.memory_space<vmem>>, %arg8: memref<1x128xf32, #tpu.memory_space<vmem>>, %arg9: memref<1x8x128xf32, #tpu.memory_space<vmem>>, %arg10: memref<8x128xf32, #tpu.memory_space<vmem>>, %arg11: memref<8x128xf32, #tpu.memory_space<vmem>>, %arg12: memref<8x128xf32, #tpu.memory_space<vmem>>, %arg13: memref<8x128xf32, #tpu.memory_space<vmem>>) attributes {dimension_semantics = [#tpu.dimension_semantics<arbitrary>], iteration_bounds = array<i64: 1>, scalar_prefetch = 0 : i64, scratch_operands = 2 : i64, tpu.core_type = #tpu.core_type<tc>, window_params = [{transform_indices = @transform_0, window_bounds = array<i64: 1, 8, 16>}, {pipeline_mode = #tpu.pipeline_mode<synchronous>, transform_indices = @transform_1, window_bounds = array<i64: 8, 128>}, {pipeline_mode = #tpu.pipeline_mode<synchronous>, transform_indices = @transform_2, window_bounds = array<i64: 8, 128>}, {pipeline_mode = #tpu.pipeline_mode<synchronous>, transform_indices = @transform_3, window_bounds = array<i64: 16, 512>}, {pipeline_mode = #tpu.pipeline_mode<synchronous>, transform_indices = @transform_4, window_bounds = array<i64: 128, 512>}, {pipeline_mode = #tpu.pipeline_mode<synchronous>, transform_indices = @transform_5, window_bounds = array<i64: 1, 512>}, {pipeline_mode = #tpu.pipeline_mode<synchronous>, transform_indices = @transform_6, window_bounds = array<i64: 128, 128>}, {pipeline_mode = #tpu.pipeline_mode<synchronous>, transform_indices = @transform_7, window_bounds = array<i64: 1, 128>}, {transform_indices = @transform_8, window_bounds = array<i64: 1, 8, 128>}, {pipeline_mode = #tpu.pipeline_mode<synchronous>, transform_indices = @transform_9, window_bounds = array<i64: 8, 128>}, {pipeline_mode = #tpu.pipeline_mode<synchronous>, transform_indices = @transform_10, window_bounds = array<i64: 8, 128>}]} {
    %c0_i32 = arith.constant 0 : i32
    %0 = arith.cmpi eq, %arg0, %c0_i32 : i32
    %1 = arith.extui %0 : i1 to i32
    %c0_i32_0 = arith.constant 0 : i32
    %2 = arith.cmpi ne, %1, %c0_i32_0 : i32
    scf.if %2 {
      %c0_33 = arith.constant 0 : index
      %c0_34 = arith.constant 0 : index
      %65 = vector.load %arg2[%c0_33, %c0_34] : memref<8x128xf32, #tpu.memory_space<vmem>>, vector<8x128xf32>
      %c0_35 = arith.constant 0 : index
      %c0_36 = arith.constant 0 : index
      %66 = vector.load %arg12[%c0_35, %c0_36] : memref<8x128xf32, #tpu.memory_space<vmem>>, vector<8x128xf32>
      tpu.vector_store %arg12[%c0_35, %c0_36], %65 {strides = array<i32>} : memref<8x128xf32, #tpu.memory_space<vmem>>, vector<8x128xf32>,
      %c0_37 = arith.constant 0 : index
      %c0_38 = arith.constant 0 : index
      %67 = vector.load %arg3[%c0_37, %c0_38] : memref<8x128xf32, #tpu.memory_space<vmem>>, vector<8x128xf32>
      %c0_39 = arith.constant 0 : index
      %c0_40 = arith.constant 0 : index
      %68 = vector.load %arg13[%c0_39, %c0_40] : memref<8x128xf32, #tpu.memory_space<vmem>>, vector<8x128xf32>
      tpu.vector_store %arg13[%c0_39, %c0_40], %67 {strides = array<i32>} : memref<8x128xf32, #tpu.memory_space<vmem>>, vector<8x128xf32>,
    } else {
    }
    %c0 = arith.constant 0 : index
    %c0_1 = arith.constant 0 : index
    %3 = vector.load %arg12[%c0, %c0_1] : memref<8x128xf32, #tpu.memory_space<vmem>>, vector<8x128xf32>
    %c0_2 = arith.constant 0 : index
    %c0_3 = arith.constant 0 : index
    %4 = vector.load %arg13[%c0_2, %c0_3] : memref<8x128xf32, #tpu.memory_space<vmem>>, vector<8x128xf32>
    %c0_4 = arith.constant 0 : index
    %c0_5 = arith.constant 0 : index
    %c0_6 = arith.constant 0 : index
    %5 = vector.load %arg1[%c0_4, %c0_5, %c0_6] : memref<1x8x16xbf16, #tpu.memory_space<vmem>>, vector<1x8x16xbf16>
    %6 = vector.shape_cast %5 : vector<1x8x16xbf16> to vector<8x16xbf16>
    %c0_7 = arith.constant 0 : index
    %c0_8 = arith.constant 0 : index
    %7 = vector.load %arg4[%c0_7, %c0_8] : memref<16x512xbf16, #tpu.memory_space<vmem>>, vector<16x512xbf16>
    %cst = arith.constant dense<0.000000e+00> : vector<8x512xf32>
    %8 = tpu.matmul %6, %7, %cst {dimension_numbers = #tpu.dot_dimension_numbers<[1], [0], [0], [1], [0, 0, 1, 1], [], []>} : vector<8x16xbf16>, vector<16x512xbf16>, vector<8x512xf32> -> vector<8x512xf32>
    %9 = arith.truncf %3 : vector<8x128xf32> to vector<8x128xbf16>
    %c0_9 = arith.constant 0 : index
    %c0_10 = arith.constant 0 : index
    %10 = vector.load %arg5[%c0_9, %c0_10] : memref<128x512xbf16, #tpu.memory_space<vmem>>, vector<128x512xbf16>
    %cst_11 = arith.constant dense<0.000000e+00> : vector<8x512xf32>
    %11 = tpu.matmul %9, %10, %cst_11 {dimension_numbers = #tpu.dot_dimension_numbers<[1], [0], [0], [1], [0, 0, 1, 1], [], []>} : vector<8x128xbf16>, vector<128x512xbf16>, vector<8x512xf32> -> vector<8x512xf32>
    %12 = arith.addf %8, %11 : vector<8x512xf32>
    %c0_12 = arith.constant 0 : index
    %c0_13 = arith.constant 0 : index
    %13 = vector.load %arg6[%c0_12, %c0_13] : memref<1x512xf32, #tpu.memory_space<vmem>>, vector<1x512xf32>
    %14 = vector.broadcast %13 : vector<1x512xf32> to vector<8x512xf32>
    %15 = arith.addf %12, %14 : vector<8x512xf32>
    %16 = vector.extract_strided_slice %15 {offsets = [0, 0], sizes = [8, 128], strides = [1, 1]} : vector<8x512xf32> to vector<8x128xf32>
    %17 = arith.negf %16 : vector<8x128xf32>
    %18 = math.exp %17 : vector<8x128xf32>
    %cst_14 = arith.constant 1.000000e+00 : f32
    %19 = vector.broadcast %cst_14 : f32 to vector<8x128xf32>
    %20 = arith.addf %19, %18 : vector<8x128xf32>
    %21 = arith.divf %19, %20 : vector<8x128xf32>
    %22 = vector.extract_strided_slice %15 {offsets = [0, 128], sizes = [8, 128], strides = [1, 1]} : vector<8x512xf32> to vector<8x128xf32>
    %23 = arith.negf %22 : vector<8x128xf32>
    %24 = math.exp %23 : vector<8x128xf32>
    %cst_15 = arith.constant 1.000000e+00 : f32
    %25 = vector.broadcast %cst_15 : f32 to vector<8x128xf32>
    %26 = arith.addf %25, %24 : vector<8x128xf32>
    %27 = arith.divf %25, %26 : vector<8x128xf32>
    %28 = vector.extract_strided_slice %15 {offsets = [0, 256], sizes = [8, 128], strides = [1, 1]} : vector<8x512xf32> to vector<8x128xf32>
    %29 = arith.negf %28 : vector<8x128xf32>
    %30 = math.exp %29 : vector<8x128xf32>
    %cst_16 = arith.constant 1.000000e+00 : f32
    %31 = vector.broadcast %cst_16 : f32 to vector<8x128xf32>
    %32 = arith.addf %31, %30 : vector<8x128xf32>
    %33 = arith.divf %31, %32 : vector<8x128xf32>
    %34 = vector.extract_strided_slice %15 {offsets = [0, 384], sizes = [8, 128], strides = [1, 1]} : vector<8x512xf32> to vector<8x128xf32>
    %35 = math.tanh %34 : vector<8x128xf32>
    %36 = arith.mulf %4, %21 : vector<8x128xf32>
    %37 = arith.mulf %35, %27 : vector<8x128xf32>
    %38 = arith.addf %36, %37 : vector<8x128xf32>
    %39 = math.tanh %38 : vector<8x128xf32>
    %40 = arith.mulf %33, %39 : vector<8x128xf32>
    %c0_17 = arith.constant 0 : index
    %c0_18 = arith.constant 0 : index
    %41 = vector.load %arg12[%c0_17, %c0_18] : memref<8x128xf32, #tpu.memory_space<vmem>>, vector<8x128xf32>
    tpu.vector_store %arg12[%c0_17, %c0_18], %40 {strides = array<i32>} : memref<8x128xf32, #tpu.memory_space<vmem>>, vector<8x128xf32>,
    %c0_19 = arith.constant 0 : index
    %c0_20 = arith.constant 0 : index
    %42 = vector.load %arg13[%c0_19, %c0_20] : memref<8x128xf32, #tpu.memory_space<vmem>>, vector<8x128xf32>
    tpu.vector_store %arg13[%c0_19, %c0_20], %38 {strides = array<i32>} : memref<8x128xf32, #tpu.memory_space<vmem>>, vector<8x128xf32>,
    %43 = arith.truncf %40 : vector<8x128xf32> to vector<8x128xbf16>
    %c0_21 = arith.constant 0 : index
    %c0_22 = arith.constant 0 : index
    %44 = vector.load %arg7[%c0_21, %c0_22] : memref<128x128xbf16, #tpu.memory_space<vmem>>, vector<128x128xbf16>
    %cst_23 = arith.constant dense<0.000000e+00> : vector<8x128xf32>
    %45 = tpu.matmul %43, %44, %cst_23 {dimension_numbers = #tpu.dot_dimension_numbers<[1], [0], [0], [1], [0, 0, 1, 1], [], []>} : vector<8x128xbf16>, vector<128x128xbf16>, vector<8x128xf32> -> vector<8x128xf32>
    %c0_24 = arith.constant 0 : index
    %c0_25 = arith.constant 0 : index
    %46 = vector.load %arg8[%c0_24, %c0_25] : memref<1x128xf32, #tpu.memory_space<vmem>>, vector<1x128xf32>
    %47 = vector.broadcast %46 : vector<1x128xf32> to vector<8x128xf32>
    %48 = arith.addf %45, %47 : vector<8x128xf32>
    %cst_26 = arith.constant dense<0xFF800000> : vector<8xf32>
    %49 = vector.multi_reduction <maximumf>, %48, %cst_26 [1] : vector<8x128xf32> to vector<8xf32>
    %50 = vector.shape_cast %49 : vector<8xf32> to vector<8x1xf32>
    %51 = vector.broadcast %50 : vector<8x1xf32> to vector<8x128xf32>
    %52 = arith.subf %48, %51 : vector<8x128xf32>
    %53 = math.exp %52 : vector<8x128xf32>
    %cst_27 = arith.constant dense<0.000000e+00> : vector<8xf32>
    %54 = vector.multi_reduction <add>, %53, %cst_27 [1] : vector<8x128xf32> to vector<8xf32>
    %55 = vector.shape_cast %54 : vector<8xf32> to vector<8x1xf32>
    %56 = math.log %55 : vector<8x1xf32>
    %57 = vector.broadcast %56 : vector<8x1xf32> to vector<8x128xf32>
    %58 = arith.subf %52, %57 : vector<8x128xf32>
    %c0_28 = arith.constant 0 : index
    %c0_29 = arith.constant 0 : index
    %c0_30 = arith.constant 0 : index
    %59 = vector.load %arg9[%c0_28, %c0_29, %c0_30] : memref<1x8x128xf32, #tpu.memory_space<vmem>>, vector<1x8x128xf32>
    %60 = vector.shape_cast %59 : vector<1x8x128xf32> to vector<8x128xf32>
    %61 = vector.shape_cast %58 : vector<8x128xf32> to vector<1x8x128xf32>
    tpu.vector_store %arg9[%c0_28, %c0_29, %c0_30], %61 {strides = array<i32>} : memref<1x8x128xf32, #tpu.memory_space<vmem>>, vector<1x8x128xf32>,
    %c0_i32_31 = arith.constant 0 : i32
    %62 = arith.cmpi eq, %arg0, %c0_i32_31 : i32
    %63 = arith.extui %62 : i1 to i32
    %c0_i32_32 = arith.constant 0 : i32
    %64 = arith.cmpi ne, %63, %c0_i32_32 : i32
    scf.if %64 {
      %c0_33 = arith.constant 0 : index
      %c0_34 = arith.constant 0 : index
      %65 = vector.load %arg10[%c0_33, %c0_34] : memref<8x128xf32, #tpu.memory_space<vmem>>, vector<8x128xf32>
      tpu.vector_store %arg10[%c0_33, %c0_34], %40 {strides = array<i32>} : memref<8x128xf32, #tpu.memory_space<vmem>>, vector<8x128xf32>,
      %c0_35 = arith.constant 0 : index
      %c0_36 = arith.constant 0 : index
      %66 = vector.load %arg11[%c0_35, %c0_36] : memref<8x128xf32, #tpu.memory_space<vmem>>, vector<8x128xf32>
      tpu.vector_store %arg11[%c0_35, %c0_36], %38 {strides = array<i32>} : memref<8x128xf32, #tpu.memory_space<vmem>>, vector<8x128xf32>,
    } else {
    }
    return
  }
  func.func @transform_0(%arg0: i32) -> (i32, i32, i32) {
    %c0_i32 = arith.constant 0 : i32
    %c0_i32_0 = arith.constant 0 : i32
    %c0_i32_1 = arith.constant 0 : i32
    return %arg0, %c0_i32, %c0_i32_0 : i32, i32, i32
  }
  func.func @transform_1(%arg0: i32) -> (i32, i32) {
    %c0_i32 = arith.constant 0 : i32
    %c0_i32_0 = arith.constant 0 : i32
    %c0_i32_1 = arith.constant 0 : i32
    return %c0_i32, %c0_i32_0 : i32, i32
  }
  func.func @transform_2(%arg0: i32) -> (i32, i32) {
    %c0_i32 = arith.constant 0 : i32
    %c0_i32_0 = arith.constant 0 : i32
    %c0_i32_1 = arith.constant 0 : i32
    return %c0_i32, %c0_i32_0 : i32, i32
  }
  func.func @transform_3(%arg0: i32) -> (i32, i32) {
    %c0_i32 = arith.constant 0 : i32
    %c0_i32_0 = arith.constant 0 : i32
    %c0_i32_1 = arith.constant 0 : i32
    return %c0_i32, %c0_i32_0 : i32, i32
  }
  func.func @transform_4(%arg0: i32) -> (i32, i32) {
    %c0_i32 = arith.constant 0 : i32
    %c0_i32_0 = arith.constant 0 : i32
    %c0_i32_1 = arith.constant 0 : i32
    return %c0_i32, %c0_i32_0 : i32, i32
  }
  func.func @transform_5(%arg0: i32) -> (i32, i32) {
    %c0_i32 = arith.constant 0 : i32
    %c0_i32_0 = arith.constant 0 : i32
    %c0_i32_1 = arith.constant 0 : i32
    return %c0_i32, %c0_i32_0 : i32, i32
  }
  func.func @transform_6(%arg0: i32) -> (i32, i32) {
    %c0_i32 = arith.constant 0 : i32
    %c0_i32_0 = arith.constant 0 : i32
    %c0_i32_1 = arith.constant 0 : i32
    return %c0_i32, %c0_i32_0 : i32, i32
  }
  func.func @transform_7(%arg0: i32) -> (i32, i32) {
    %c0_i32 = arith.constant 0 : i32
    %c0_i32_0 = arith.constant 0 : i32
    %c0_i32_1 = arith.constant 0 : i32
    return %c0_i32, %c0_i32_0 : i32, i32
  }
  func.func @transform_8(%arg0: i32) -> (i32, i32, i32) {
    %c0_i32 = arith.constant 0 : i32
    %c0_i32_0 = arith.constant 0 : i32
    %c0_i32_1 = arith.constant 0 : i32
    return %arg0, %c0_i32, %c0_i32_0 : i32, i32, i32
  }
  func.func @transform_9(%arg0: i32) -> (i32, i32) {
    %c0_i32 = arith.constant 0 : i32
    %c0_i32_0 = arith.constant 0 : i32
    %c0_i32_1 = arith.constant 0 : i32
    return %c0_i32, %c0_i32_0 : i32, i32
  }
  func.func @transform_10(%arg0: i32) -> (i32, i32) {
    %c0_i32 = arith.constant 0 : i32
    %c0_i32_0 = arith.constant 0 : i32
    %c0_i32_1 = arith.constant 0 : i32
    return %c0_i32, %c0_i32_0 : i32, i32
  }
}

</mosaic_0001>

<bundles_post_ra>
// kernel: tpu_custom_call.1
= control target key start
LH: loop header
LB: loop body
LE: loop exit
PB: predicated region body
PF: predicated region fallthrough
CT: control target
= control target key end

     0   :  { %16 = vsyncpa [#allocation5], 0  ;;  %s1277_s0 = inlined_call_operand.hbm [shape: bf16[1,8,16], index: 0, kind: input, shape index: {}]   ;;  %s1278_s1 = inlined_call_operand.hbm [shape: f32[8,128], index: 1, kind: input, shape index: {}]   ;;  %s1279_s2 = inlined_call_operand.hbm [shape: f32[8,128], index: 2, kind: input, shape index: {}]   ;;  %s1280_s3 = inlined_call_operand.hbm [shape: bf16[16,512], index: 3, kind: input, shape index: {}]   ;;  %s1281_s4 = inlined_call_operand.hbm [shape: bf16[128,512], index: 4, kind: input, shape index: {}]   ;;  %s1282_s5 = inlined_call_operand.vmem [shape: f32[1,512], index: 5, kind: input, shape index: {}]   ;;  %s1283_s6 = inlined_call_operand.hbm [shape: bf16[128,128], index: 6, kind: input, shape index: {}]   ;;  %s1284_s7 = inlined_call_operand.vmem [shape: f32[1,128], index: 7, kind: input, shape index: {}]   ;;  %s1285_s8 = inlined_call_operand.hbm [shape: f32[1,8,128], index: 8, kind: output, shape index: {0}]   ;;  %s1286_s9 = inlined_call_operand.hbm [shape: f32[8,128], index: 9, kind: output, shape index: {1}]   ;;  %s1287_s10 = inlined_call_operand.hbm [shape: f32[8,128], index: 10, kind: output, shape index: {2}]  }
   0x1   :  { %17 = vsyncpa [#allocation8], 0 }
   0x2   :  { %18 = vsyncpa [#allocation11], 0 }
   0x3   :  { %19 = vsyncpa [#allocation14], 0 }
   0x4   :  { %20 = vsyncpa [#allocation6], 0  ;;  %s38_s15 = sshll.u32 %s1278_s1, 4  ;;  %s39_s15 = int_to_ptr.hbm [resolvable:$true] %s38_s15 }
   0x5   :  { %21 = vsyncpa [#allocation17], 0  ;;  %s1176_s16 = smov [#allocation7]   ;;  %s59_s20 = sshll.u32 %s1280_s3, 4  ;;  %s60_s20 = int_to_ptr.hbm [resolvable:$true] %s59_s20 }
   0x6   :  { %s40_s17 = sshll.u32 %s1176_s16, 4  ;;  %s1177_s21 = smov [#allocation10]   ;;  %s41_s17 = int_to_ptr.vmem [resolvable:$true] %s40_s17 }
   0x7   :  { %43 = dma.hbm_to_vmem [thread:$0]  %s39_s15, 128, %s41_s17, [#allocation8]  }
   0x8   :  { %s61_s22 = sshll.u32 %s1177_s21, 4  ;;  %s1178_s23 = smov 256   ;;  %s62_s22 = int_to_ptr.vmem [resolvable:$true] %s61_s22 }
   0x9   :  { %s1179_s24 = smov 16   ;;  %s27_s1 = sshll.u32 %s1277_s0, 4  ;;  %s28_s1 = int_to_ptr.hbm [resolvable:$true] %s27_s1 }
   0xa   :  { %67 = dma.hbm_to_vmem [thread:$0]  %s60_s20, 512, %s62_s22, [#allocation11], %s1178_s23, %s1178_s23, %s1179_s24  }
   0xb   :  { %s1180_s27 = smov [#allocation4]   ;;  %s49_s3 = sshll.u32 %s1279_s2, 4  ;;  %s50_s3 = int_to_ptr.hbm [resolvable:$true] %s49_s3 }
   0xc   :  { %s29_s28 = sshll.u32 %s1180_s27, 4  ;;  %s1181_s11 = smov [#allocation9]   ;;  %s30_s28 = int_to_ptr.vmem [resolvable:$true] %s29_s28 }
   0xd   :  { %32 = dma.hbm_to_vmem [thread:$0]  %s28_s1, 64, %s30_s28, [#allocation5]  }
   0xe   :  { %s51_s12 = sshll.u32 %s1181_s11, 4  ;;  %s72_s15 = sshll.u32 %s1281_s4, 4  ;;  %s52_s12 = int_to_ptr.vmem [resolvable:$true] %s51_s12  ;;  %s73_s15 = int_to_ptr.hbm [resolvable:$true] %s72_s15 }
   0xf   :  { %54 = dma.hbm_to_vmem [thread:$0]  %s50_s3, 128, %s52_s12, [#allocation8]  }
  0x10   :  { %s87_s17 = sshll.u32 %s1283_s6, 4  ;;  %s1182_s18 = smov [#allocation12]   ;;  %s88_s17 = int_to_ptr.hbm [resolvable:$true] %s87_s17 }
  0x11   :  { %s74_s19 = sshll.u32 %s1182_s18, 4  ;;  %s1183_s2 = smov [#allocation13]   ;;  %s75_s19 = int_to_ptr.vmem [resolvable:$true] %s74_s19 }
  0x12   :  { %80 = dma.hbm_to_vmem [thread:$0]  %s73_s15, 4096, %s75_s19, [#allocation11], %s1178_s23, %s1178_s23, %s1179_s24  }
  0x13   :  { %s89_s20 = sshll.u32 %s1183_s2, 4  ;;  %s1184_s21 = smov 64   ;;  %s90_s20 = int_to_ptr.vmem [resolvable:$true] %s89_s20 }
  0x14   :  { %s1185_s22 = smov 4  }
  0x15   :  { %95 = dma.hbm_to_vmem [thread:$0]  %s88_s17, 1024, %s90_s20, [#allocation14], %s1184_s21, %s1184_s21, %s1185_s22  }
  0x16   :  { %1164 = dma.done.wait [#allocation5], 64  }
  0x17   :  { %1165 = vsyncadd [#allocation5], 4294967232 }
  0x18   :  { %1166 = dma.done.wait [#allocation8], 256  }
  0x19   :  { %1167 = vsyncadd [#allocation8], 4294967040 }
  0x1a   :  { %1168 = dma.done.wait [#allocation11], 4608  }
  0x1b   :  { %1169 = vsyncadd [#allocation11], 4294962688 }
  0x1c   :  { %1170 = dma.done.wait [#allocation14], 1024  }
  0x1d   :  { %1171 = vsyncadd [#allocation14], 4294966272  ;;  %v902_v0 = vld [vmem:[#allocation12 + $0xe4] sm:$0xf]  ;;  %v803_v1 = vld [vmem:[#allocation12 + $0xf0] sm:$0xf0] }
  0x1e   :  { %v809_v2 = vld [vmem:[#allocation12 + $0xe8] sm:$0xf]  ;;  %v806_v3 = vor.u32 %v902_v0, %v803_v1  ;;  %v905_v4 = vld [vmem:[#allocation12 + $0xf4] sm:$0xf0]  ;;  %v898_v5 = vld [vmem:[#allocation12 + $0xc4] sm:$0xf] }
  0x1f   :  { %v787_v6 = vld [vmem:[#allocation12 + $0xd0] sm:$0xf0]  ;;  %v810_v7 = vor.u32 %v905_v4, %v809_v2  ;;  %v793_v8 = vld [vmem:[#allocation12 + $0xc8] sm:$0xf]  ;;  %v901_v9 = vld [vmem:[#allocation12 + $0xd4] sm:$0xf0] }
  0x20   :  { %344 = vmatpush.bf16.msra.mxu1 %v806_v3  ;;  %v790_v10 = vor.u32 %v898_v5, %v787_v6  ;;  %v794_v11 = vor.u32 %v901_v9, %v793_v8  ;;  %v894_v12 = vld [vmem:[#allocation12 + $0xa4] sm:$0xf]  ;;  %v771_v13 = vld [vmem:[#allocation12 + $0xb0] sm:$0xf0]  ;;  %v777_v14 = vld [vmem:[#allocation12 + $0xa8] sm:$0xf] }
  0x21   :  { %357 = vmatpush.bf16.msra.mxu2 %v810_v7  ;;  %v897_v15 = vld [vmem:[#allocation12 + $0xb4] sm:$0xf0]  ;;  %v903_v16 = vld [vmem:[#allocation12 + $0xec] sm:$0xf]  ;;  %v811_v17 = vld [vmem:[#allocation12 + $0xf8] sm:$0xf0]  ;;  %v774_v21 = vor.u32 %v894_v12, %v771_v13 }
  0x22   :  { %v814_v18 = vor.u32 %v903_v16, %v811_v17  ;;  %v801_v19 = vld [vmem:[#allocation12 + $0xe0] sm:$0xf]  ;;  %v904_v20 = vld [vmem:[#allocation12 + $0xec] sm:$0xf0]  ;;  %v890_v22 = vld [vmem:[#allocation12 + $0x84] sm:$0xf]  ;;  %v778_v25 = vor.u32 %v897_v15, %v777_v14 }
  0x23   :  { %v755_v23 = vld [vmem:[#allocation12 + $0x90] sm:$0xf0]  ;;  %v802_v24 = vor.u32 %v904_v20, %v801_v19  ;;  %v899_v26 = vld [vmem:[#allocation12 + $0xcc] sm:$0xf]  ;;  %v795_v27 = vld [vmem:[#allocation12 + $0xd8] sm:$0xf0] }
  0x24   :  { %345 = vmatpush.bf16.msra.mxu1 %v790_v10  ;;  %370 = vmatpush.bf16.msra.mxu3 %v814_v18  ;;  %v785_v28 = vld [vmem:[#allocation12 + $0xc0] sm:$0xf]  ;;  %v761_v29 = vld [vmem:[#allocation12 + $0x88] sm:$0xf]  ;;  %v893_v30 = vld [vmem:[#allocation12 + $0x94] sm:$0xf0]  ;;  %v798_v31 = vor.u32 %v899_v26, %v795_v27  ;;  %v758_v35 = vor.u32 %v890_v22, %v755_v23 }
  0x25   :  { %358 = vmatpush.bf16.msra.mxu2 %v794_v11  ;;  %331 = vmatpush.bf16.msra.mxu0 %v802_v24  ;;  %v900_v32 = vld [vmem:[#allocation12 + $0xcc] sm:$0xf0]  ;;  %v895_v34 = vld [vmem:[#allocation12 + $0xac] sm:$0xf]  ;;  %v779_v36 = vld [vmem:[#allocation12 + $0xb8] sm:$0xf0]  ;;  %v762_v39 = vor.u32 %v893_v30, %v761_v29 }
  0x26   :  { %v786_v33 = vor.u32 %v900_v32, %v785_v28  ;;  %v769_v37 = vld [vmem:[#allocation12 + $0xa0] sm:$0xf]  ;;  %v896_v38 = vld [vmem:[#allocation12 + $0xac] sm:$0xf0]  ;;  %v886_v40 = vld [vmem:[#allocation12 + $0x64] sm:$0xf]  ;;  %v782_v43 = vor.u32 %v895_v34, %v779_v36 }
  0x27   :  { %v739_v41 = vld [vmem:[#allocation12 + $0x70] sm:$0xf0]  ;;  %v745_v42 = vld [vmem:[#allocation12 + $0x68] sm:$0xf]  ;;  %v889_v44 = vld [vmem:[#allocation12 + $0x74] sm:$0xf0]  ;;  %v770_v45 = vor.u32 %v896_v38, %v769_v37 }
  0x28   :  { %346 = vmatpush.bf16.msra.mxu1 %v774_v21  ;;  %371 = vmatpush.bf16.msra.mxu3 %v798_v31  ;;  %v891_v46 = vld [vmem:[#allocation12 + $0x8c] sm:$0xf]  ;;  %v763_v47 = vld [vmem:[#allocation12 + $0x98] sm:$0xf0]  ;;  %v753_v48 = vld [vmem:[#allocation12 + $0x80] sm:$0xf]  ;;  %v742_v50 = vor.u32 %v886_v40, %v739_v41  ;;  %v746_v51 = vor.u32 %v889_v44, %v745_v42 }
  0x29   :  { %359 = vmatpush.bf16.msra.mxu2 %v778_v25  ;;  %332 = vmatpush.bf16.msra.mxu0 %v786_v33  ;;  %v892_v49 = vld [vmem:[#allocation12 + $0x8c] sm:$0xf0]  ;;  %v882_v52 = vld [vmem:[#allocation12 + $0x44] sm:$0xf]  ;;  %v723_v53 = vld [vmem:[#allocation12 + $0x50] sm:$0xf0]  ;;  %v766_v55 = vor.u32 %v891_v46, %v763_v47 }
  0x2a   :  { %v729_v54 = vld [vmem:[#allocation12 + $0x48] sm:$0xf]  ;;  %v885_v56 = vld [vmem:[#allocation12 + $0x54] sm:$0xf0]  ;;  %v754_v57 = vor.u32 %v892_v49, %v753_v48  ;;  %v887_v58 = vld [vmem:[#allocation12 + $0x6c] sm:$0xf]  ;;  %v726_v62 = vor.u32 %v882_v52, %v723_v53 }
  0x2b   :  { %v747_v59 = vld [vmem:[#allocation12 + $0x78] sm:$0xf0]  ;;  %v737_v60 = vld [vmem:[#allocation12 + $0x60] sm:$0xf]  ;;  %v888_v61 = vld [vmem:[#allocation12 + $0x6c] sm:$0xf0]  ;;  %v730_v63 = vor.u32 %v885_v56, %v729_v54 }
  0x2c   :  { %347 = vmatpush.bf16.msra.mxu1 %v758_v35  ;;  %372 = vmatpush.bf16.msra.mxu3 %v782_v43  ;;  %v878_v0 = vld [vmem:[#allocation12 + $0x24] sm:$0xf]  ;;  %v707_v1 = vld [vmem:[#allocation12 + $0x30] sm:$0xf0]  ;;  %v713_v2 = vld [vmem:[#allocation12 + $0x28] sm:$0xf]  ;;  %v750_v3 = vor.u32 %v887_v58, %v747_v59  ;;  %v738_v5 = vor.u32 %v888_v61, %v737_v60 }
  0x2d   :  { %360 = vmatpush.bf16.msra.mxu2 %v762_v39  ;;  %333 = vmatpush.bf16.msra.mxu0 %v770_v45  ;;  %v881_v4 = vld [vmem:[#allocation12 + $0x34] sm:$0xf0]  ;;  %v883_v6 = vld [vmem:[#allocation12 + $0x4c] sm:$0xf]  ;;  %v731_v7 = vld [vmem:[#allocation12 + $0x58] sm:$0xf0]  ;;  %v710_v10 = vor.u32 %v878_v0, %v707_v1 }
  0x2e   :  { %v721_v8 = vld [vmem:[#allocation12 + $0x40] sm:$0xf]  ;;  %v884_v9 = vld [vmem:[#allocation12 + $0x4c] sm:$0xf0]  ;;  %v874_v11 = vld [vmem:[#allocation12 + $0x4] sm:$0xf]  ;;  %v714_v13 = vor.u32 %v881_v4, %v713_v2  ;;  %v734_v16 = vor.u32 %v883_v6, %v731_v7 }
  0x2f   :  { %v691_v12 = vld [vmem:[#allocation12 + $0x10] sm:$0xf0]  ;;  %v697_v14 = vld [vmem:[#allocation12 + $0x8] sm:$0xf]  ;;  %v877_v15 = vld [vmem:[#allocation12 + $0x14] sm:$0xf0]  ;;  %v722_v19 = vor.u32 %v884_v9, %v721_v8 }
  0x30   :  { %348 = vmatpush.bf16.msra.mxu1 %v742_v50  ;;  %373 = vmatpush.bf16.msra.mxu3 %v766_v55  ;;  %v817_v17 = vld [vmem:[#allocation10] sm:$0xf]  ;;  %v872_v18 = vld [vmem:[#allocation10 + $0xc] sm:$0xf0]  ;;  %v879_v20 = vld [vmem:[#allocation12 + $0x2c] sm:$0xf]  ;;  %v694_v24 = vor.u32 %v874_v11, %v691_v12  ;;  %v698_v28 = vor.u32 %v877_v15, %v697_v14 }
  0x31   :  { %361 = vmatpush.bf16.msra.mxu2 %v746_v51  ;;  %334 = vmatpush.bf16.msra.mxu0 %v754_v57  ;;  %v715_v21 = vld [vmem:[#allocation12 + $0x38] sm:$0xf0]  ;;  %v705_v22 = vld [vmem:[#allocation12 + $0x20] sm:$0xf]  ;;  %v880_v23 = vld [vmem:[#allocation12 + $0x2c] sm:$0xf0]  ;;  %v818_v29 = vor.u32 %v872_v18, %v817_v17 }
  0x32   :  { %v127_v25 = vld [vmem:[#allocation7] sm:$0xff]  ;;  %v825_v26 = vld [vmem:[#allocation10 + $0x8] sm:$0xf]  ;;  %v873_v27 = vld [vmem:[#allocation10 + $0x14] sm:$0xf0]  ;;  %v718_v32 = vor.u32 %v879_v20, %v715_v21  ;;  %v706_v33 = vor.u32 %v880_v23, %v705_v22  ;;  %vm403_vm0 = vcmask 130048  }
  0x33   :  { %v870_v30 = vld [vmem:[#allocation10 + $0x4] sm:$0xf]  ;;  %v819_v31 = vld [vmem:[#allocation10 + $0x10] sm:$0xf0]  ;;  %v875_v34 = vld [vmem:[#allocation12 + $0xc] sm:$0xf]  ;;  %v138_v35 = vpack.c.bf16 %v127_v25, %v127_v25  ;;  %v826_v39 = vor.u32 %v873_v27, %v825_v26 }
  0x34   :  { %349 = vmatpush.bf16.msra.mxu1 %v726_v62  ;;  %374 = vmatpush.bf16.msra.mxu3 %v750_v3  ;;  %v699_v36 = vld [vmem:[#allocation12 + $0x18] sm:$0xf0]  ;;  %v689_v37 = vld [vmem:[#allocation12] sm:$0xf]  ;;  %v876_v38 = vld [vmem:[#allocation12 + $0xc] sm:$0xf0]  ;;  %v822_v40 = vor.u32 %v870_v30, %v819_v31 }
  0x35   :  { %362 = vmatpush.bf16.msra.mxu2 %v730_v63  ;;  %335 = vmatpush.bf16.msra.mxu0 %v738_v5  ;;  %v871_v41 = vld [vmem:[#allocation10 + $0xc] sm:$0xf]  ;;  %v827_v42 = vld [vmem:[#allocation10 + $0x18] sm:$0xf0]  ;;  %v702_v43 = vor.u32 %v875_v34, %v699_v36  ;;  %v690_v44 = vor.u32 %v876_v38, %v689_v37  ;;  %v912_v61 = vld [vmem:[#allocation13 + $0x30] sm:$0xff]  ;;  %s1186_s24 = smov [#allocation16]  }
  0x36   :  { %v830_v45 = vor.u32 %v871_v41, %v827_v42  ;;  %v133_v46 = vld [vmem:[#allocation4] sm:$0xf]  ;;  %v913_v57 = vld [vmem:[#allocation13 + $0x38] sm:$0xff]  ;;  %v910_v6 = vld [vmem:[#allocation13 + $0x20] sm:$0xff]  ;;  %s652_s25 = sshll.u32 %s1186_s24, 4  ;;  %s654_s27 = sshll.u32 %s1286_s9, 4  ;;  %s653_s25 = int_to_ptr.vmem [resolvable:$true] %s652_s25  ;;  %s655_s27 = int_to_ptr.hbm [resolvable:$true] %s654_s27 }
  0x37   :  { %v459_v51 = vld [vmem:[%s1282_s5] sm:$0xf]  ;;  %v908_v17 = vld [vmem:[#allocation13 + $0x10] sm:$0xff]  ;;  %v906_v23 = vld [vmem:[#allocation13] sm:$0xff]  ;;  %s665_s3 = sshll.u32 %s1287_s10, 4  ;;  %s1188_s11 = smov [#allocation15]   ;;  %s666_s3 = int_to_ptr.hbm [resolvable:$true] %s665_s3 }
  0x38   :  { %350 = vmatpush.bf16.msra.mxu1 %v710_v10  ;;  %375 = vmatpush.bf16.msra.mxu3 %v734_v16  ;;  %v461_v55 = vperm.slane %v459_v51, 0  ;;  %v463_v63 = vperm.slane %v459_v51, 2  ;;  %v911_v3 = vld [vmem:[#allocation13 + $0x28] sm:$0xff]  ;;  %v462_v10 = vperm.slane %v459_v51, 1  ;;  %v464_v30 = vperm.slane %v459_v51, 3  ;;  %s641_s12 = sshll.u32 %s1188_s11, 4  ;;  %s642_s12 = int_to_ptr.vmem [resolvable:$true] %s641_s12 }
  0x39   :  { %363 = vmatpush.bf16.msra.mxu2 %v714_v13  ;;  %336 = vmatpush.bf16.msra.mxu0 %v722_v19  ;;  %v909_v13 = vld [vmem:[#allocation13 + $0x18] sm:$0xff]  ;;  %v907_v19 = vld [vmem:[#allocation13 + $0x8] sm:$0xff]  ;;  %s643_s14 = sshll.u32 %s1285_s8, 4  ;;  %s644_s14 = int_to_ptr.hbm [resolvable:$true] %s643_s14 }
  0x3c   :  { %351 = vmatpush.bf16.msra.mxu1 %v694_v24  ;;  %376 = vmatpush.bf16.msra.mxu3 %v718_v32 }
  0x3d   :  { %364 = vmatpush.bf16.msra.mxu2 %v698_v28  ;;  %337 = vmatpush.bf16.msra.mxu0 %v706_v33 }
  0x3f   :  { %352 = vmatmul.bf16.vlgmr.msra.gmra.mxu1 %v138_v35 }
  0x40   :  { %414 = vmatpush.bf16.msrb.mxu1 %v818_v29  ;;  %365 = vmatmul.bf16.vlgmr.msra.gmra.mxu2 %v138_v35 }
  0x41   :  { %440 = vmatpush.bf16.msrb.mxu2 %v826_v39  ;;  %377 = vmatpush.bf16.msra.mxu3 %v702_v43 }
  0x42   :  { %338 = vmatpush.bf16.msra.mxu0 %v690_v44 }
  0x44   :  { %427 = vmatpush.bf16.msra.mxu1 %v822_v40  ;;  %378 = vmatmul.bf16.vlgmr.msra.gmra.mxu3 %v138_v35 }
  0x45   :  { %453 = vmatpush.bf16.msrb.mxu3 %v830_v45  ;;  %339 = vmatmul.bf16.vlgmr.msra.gmra.mxu0 %v138_v35 }
  0x46   :  { %607 = vmatpush.bf16.msrb.mxu0 %v913_v57 }
  0x4a   :  { %608 = vmatpush.bf16.msrb.mxu0 %v912_v61 }
  0x4e   :  { %609 = vmatpush.bf16.msrb.mxu0 %v911_v3  ;;  %v927_v3 = vld [vmem:[%s1284_s7] ss:$0 sm:$0xff]  ;;  %s1187_s7 = smov [#allocation18]  }
  0x4f   :  { %831 = vmatmul.msk.bf16.vlgmr.msrb.gmra.mxu1 %vm403_vm0, %v133_v46  ;;  %s663_s28 = sshll.u32 %s1187_s7, 4  ;;  %s664_s28 = int_to_ptr.vmem [resolvable:$true] %s663_s28 }
  0x50   :  { %833 = vmatmul.msk.bf16.vlgmr.msrb.gmra.mxu2 %vm403_vm0, %v133_v46 }
  0x52   :  { %610 = vmatpush.bf16.msrb.mxu0 %v910_v6 }
  0x54   :  { %834 = vmatmul.msk.bf16.vlgmr.msrb.gmra.mxu3 %vm403_vm0, %v133_v46 }
  0x56   :  { %611 = vmatpush.bf16.msrb.mxu0 %v909_v13 }
  0x5a   :  { %612 = vmatpush.bf16.msrb.mxu0 %v908_v17 }
  0x5e   :  { %613 = vmatpush.bf16.msrb.mxu0 %v907_v19 }
  0x5f   :  { %832 = vmatmul.msk.bf16.vlgmr.msra.gmra.mxu1 %vm403_vm0, %v133_v46 }
  0x62   :  { %614 = vmatpush.bf16.msrb.mxu0 %v906_v23 }
  0xbc   :  { %v353_v47 = vpop.f32.mrf.mxu1 }
  0xc2   :  { %v340_v48 = vpop.f32.mrf.mxu0 }
  0xc3   :  { %v366_v49 = vpop.f32.mrf.mxu2 }
  0xc4   :  { %v355_v50 = vpop.f32.mrf.mxu1 }
  0xc7   :  { %v379_v52 = vpop.f32.mrf.mxu3 }
  0xca   :  { %v342_v53 = vpop.f32.mrf.mxu0 }
  0xcb   :  { %v368_v54 = vpop.f32.mrf.mxu2 }
  0xcc   :  { %v416_v56 = vpop.f32.mrf.mxu1 }
  0xcd   :  { %v417_v58 = vadd.f32 %v416_v56, %v340_v48  ;;  %v129_v48 = vld [vmem:[#allocation9] sm:$0xff] }
  0xcf   :  { %v469_v59 = vadd.f32 %v461_v55, %v417_v58  ;;  %v381_v60 = vpop.f32.mrf.mxu3 }
  0xd1   :  { %v835_v62 = vmul.f32 -1.442695, %v469_v59 }
  0xd3   :  { %928 = vpow2.f32 %v835_v62  ;;  %v442_v0 = vpop.f32.mrf.mxu2 }
  0xd4   :  { %v443_v1 = vadd.f32 %v442_v0, %v366_v49  ;;  %v418_v2 = vpop.f32.mrf.mxu1 }
  0xd6   :  { %v471_v4 = vadd.f32 %v463_v63, %v443_v1 }
  0xd7   :  { %v455_v5 = vpop.f32.mrf.mxu3 }
  0xd8   :  { %v837_v8 = vmul.f32 -1.442695, %v471_v4  ;;  %v456_v29 = vadd.f32 %v455_v5, %v379_v52 }
  0xd9   :  { %v929_v7 = vpop.eup %928 }
  0xda   :  { %v476_v9 = vadd.f32 1.0, %v929_v7  ;;  %930 = vpow2.f32 %v837_v8  ;;  %v472_v34 = vadd.f32 %v464_v30, %v456_v29 }
  0xdb   :  { %v444_v11 = vpop.f32.mrf.mxu2 }
  0xdc   :  { %v429_v12 = vpop.f32.mrf.mxu1  ;;  %932 = vrcp.f32 %v476_v9  ;;  %v488_v37 = vand.u32 2147483648, %v476_v9  ;;  %vm482_vm2 = vweird.f32 %v476_v9  ;;  %v486_v40 = vand.u32 2147483647, %v476_v9 }
  0xdd   :  { %v430_v14 = vadd.f32 %v429_v12, %v353_v47 }
  0xde   :  { %v489_v45 = vor.u32 1.1754944e-38, %v488_v37  ;;  %vm487_vm5 = vcmp.eq.f32.partialorder %v486_v40, 8.507059e+37 }
  0xdf   :  { %v470_v15 = vadd.f32 %v462_v10, %v430_v14  ;;  %v457_v16 = vpop.f32.mrf.mxu3 }
  0xe0   :  { %v931_v20 = vpop.eup %930 }
  0xe1   :  { %v836_v18 = vmul.f32 -1.442695, %v470_v15  ;;  %v514_v25 = vadd.f32 1.0, %v931_v20 }
  0xe2   :  { %v933_v22 = vpop.eup %932 }
  0xe3   :  { %934 = vpow2.f32 %v836_v18  ;;  %v478_v24 = vmul.f32 %v933_v22, %v476_v9  ;;  %vm483_vm1 = vweird.f32 %v933_v22  ;;  %v526_v59 = vand.u32 2147483648, %v514_v25 }
  0xe4   :  { %v431_v21 = vpop.f32.mrf.mxu1  ;;  %936 = vrcp.f32 %v514_v25  ;;  %vm484_vm3 = vmor %vm482_vm2, %vm483_vm1  ;;  %vm520_vm10 = vweird.f32 %v514_v25  ;;  %v524_v60 = vand.u32 2147483647, %v514_v25 }
  0xe5   :  { %v479_v28 = vsub.f32 1.0, %v478_v24  ;;  %v527_v62 = vor.u32 1.1754944e-38, %v526_v59 }
  0xe6   :  { %vm525_vm12 = vcmp.eq.f32.partialorder %v524_v60, 8.507059e+37 }
  0xe7   :  { %v480_v31 = vmul.f32 %v933_v22, %v479_v28 }
  0xe9   :  { %v935_v26 = vpop.eup %934  ;;  %v481_v36 = vadd.f32 %v933_v22, %v480_v31 }
  0xea   :  { %v495_v27 = vadd.f32 1.0, %v935_v26  ;;  %v937_v32 = vpop.eup %936 }
  0xeb   :  { %v516_v38 = vmul.f32 %v937_v32, %v514_v25  ;;  %v485_v42 = vsel %vm484_vm3, %v933_v22, %v481_v36  ;;  %vm521_vm9 = vweird.f32 %v937_v32 }
  0xec   :  { %938 = vrcp.f32 %v495_v27  ;;  %v507_v41 = vand.u32 2147483648, %v495_v27  ;;  %v505_v44 = vand.u32 2147483647, %v495_v27  ;;  %vm501_vm6 = vweird.f32 %v495_v27  ;;  %vm522_vm11 = vmor %vm520_vm10, %vm521_vm9 }
  0xed   :  { %940 = vtanh.f32 %v472_v34  ;;  %v517_v46 = vsub.f32 1.0, %v516_v38  ;;  %v490_v49 = vsel %vm487_vm5, %v489_v45, %v485_v42 }
  0xee   :  { %v508_v50 = vor.u32 1.1754944e-38, %v507_v41  ;;  %vm506_vm8 = vcmp.eq.f32.partialorder %v505_v44, 8.507059e+37  ;;  %v531_v55 = vmul.f32 %v490_v49, %v129_v48 }
  0xef   :  { %v518_v54 = vmul.f32 %v937_v32, %v517_v46 }
  0xf1   :  { %v519_v58 = vadd.f32 %v937_v32, %v518_v54 }
  0xf2   :  { %v939_v33 = vpop.eup %938 }
  0xf3   :  { %v497_v35 = vmul.f32 %v939_v33, %v495_v27  ;;  %vm502_vm4 = vweird.f32 %v939_v33  ;;  %v941_v52 = vpop.eup %940  ;;  %v523_v61 = vsel %vm522_vm11, %v937_v32, %v519_v58 }
  0xf4   :  { %vm503_vm7 = vmor %vm501_vm6, %vm502_vm4  ;;  %v528_v0 = vsel %vm525_vm12, %v527_v62, %v523_v61 }
  0xf5   :  { %v498_v39 = vsub.f32 1.0, %v497_v35 }
  0xf7   :  { %v499_v43 = vmul.f32 %v939_v33, %v498_v39 }
  0xf9   :  { %v500_v47 = vadd.f32 %v939_v33, %v499_v43 }
  0xfb   :  { %v504_v51 = vsel %vm503_vm7, %v939_v33, %v500_v47 }
  0xfc   :  { %v509_v53 = vsel %vm506_vm8, %v508_v50, %v504_v51 }
  0xfd   :  { %v532_v56 = vmul.f32 %v941_v52, %v509_v53 }
  0xff   :  { %v533_v57 = vadd.f32 %v532_v56, %v531_v55 }
 0x101   :  { %635 = vst [vmem:[#allocation18] sm:$0xff] %v533_v57  ;;  %942 = vtanh.f32 %v533_v57 }
 0x107   :  { %v943_v63 = vpop.eup %942 }
 0x108   :  { %v535_v1 = vmul.f32 %v943_v63, %v528_v0 }
 0x10a   :  { %v538_v2 = vpack.c.bf16 %v535_v1, %v535_v1  ;;  %634 = vst [vmem:[#allocation16] sm:$0xff] %v535_v1 }
 0x10b   :  { %657 = dma.vmem_to_hbm [thread:$0]  %s653_s25, 128, %s655_s27, [#allocation17]  }
 0x10c   :  { %615 = vmatmul.bf16.vlgmr.msrb.gmra.mxu0 %v538_v2  ;;  %668 = dma.vmem_to_hbm [thread:$0]  %s664_s28, 128, %s666_s3, [#allocation17]  }
 0x189   :  { %v616_v4 = vpop.f32.mrf.mxu0 }
 0x18a   :  { %v617_v5 = vadd.f32 %v927_v3, %v616_v4 }
 0x18c   :  { %620 = vmax.xlane.f32.xlu0 %v617_v5 }
 0x191   :  { %v618_v6 = vpop.f32.mrf.mxu0 }
 0x1ff   :  { %v621_v7 = vpop.xlane.xlu0 %620 }
 0x200   :  { %v622_v8 = vsub.f32 %v617_v5, %v621_v7 }
 0x202   :  { %v623_v9 = vmul.f32 1.442695, %v622_v8 }
 0x204   :  { %944 = vpow2.f32 %v623_v9 }
 0x20a   :  { %v945_v10 = vpop.eup %944 }
 0x20b   :  { %625 = vadd.xlane.f32.xlu0 %v945_v10 }
 0x27e   :  { %v626_v11 = vpop.xlane.xlu0 %625 }
 0x27f   :  { %946 = vlog2.f32 %v626_v11 }
 0x285   :  { %v947_v12 = vpop.eup %946 }
 0x286   :  { %v628_v13 = vmul.f32 0.6931472, %v947_v12 }
 0x288   :  { %v629_v14 = vsub.f32 %v622_v8, %v628_v13 }
 0x28a   :  { %630 = vst [vmem:[#allocation15] sm:$0xff] %v629_v14 }
 0x28b   :  { %646 = dma.vmem_to_hbm [thread:$0]  %s642_s12, 128, %s644_s14, [#allocation6]  }
 0x28c   :  { %1172 = dma.done.wait [#allocation6], 128  }
 0x28d   :  { %1173 = vsyncadd [#allocation6], 4294967168 }
 0x28e   :  { %1174 = dma.done.wait [#allocation17], 256  }
 0x28f   :  { %1175 = vsyncadd [#allocation17], 4294967040 }
 0x290   :  { %681 = vsyncpa [#allocation5], 1 }
 0x291   :  { %682 = vsyncpa [#allocation8], 1 }
 0x292   :  { %683 = vsyncpa [#allocation11], 1 }
 0x293   :  { %684 = vsyncpa [#allocation14], 1 }
 0x294   :  { %685 = vsyncpa [#allocation6], 1 }
 0x295   :  { %686 = vsyncpa [#allocation17], 1 }

</bundles_post_ra>
